<compile_context>
chip_gen: v7x
topology: tpu7x:2x2x1
jax: 0.10.0
libtpu: 0.0.40
codegen_flags: <defaults>
</compile_context>

<pallas_src>
import numpy as np
import jax
import jax.numpy as jnp
from jax.experimental import pallas as pl
from jax.experimental.pallas import tpu as pltpu

NP = 21        # pooled-stats columns: [2x2 pool (4) | 4x4 pool (16) | global mean (1)]
NU = 21        # upsample rows:        [4x4 up (16)  | 2x2 up (4)    | ones (1)]
NU_PAD = 32    # NU zero-padded to a sublane-aligned K (multiple of 16 for bf16)


# ----------------------------- constant operators -----------------------------

def adaptive_pool_1d(n, o):
    """PyTorch AdaptiveAvgPool bin rule as an (o, n) averaging matrix."""
    P = np.zeros((o, n), np.float32)
    for i in range(o):
        s = (i * n) // o
        e = -(-((i + 1) * n) // o)  # ceil
        P[i, s:e] = 1.0 / (e - s)
    return P


def adaptive_pool_matrix(H, W, o):
    """(o*o, H*W) matrix so that pooled_flat = P @ x_flat (row-major flatten)."""
    return np.kron(adaptive_pool_1d(H, o), adaptive_pool_1d(W, o)).astype(np.float32)


def bilinear_up_matrix(s, H, W):
    """(H*W, s*s) matrix for F.interpolate(..., mode='bilinear', align_corners=True)."""
    U = np.zeros((H * W, s * s), np.float32)
    if s == 1:
        U[:, 0] = 1.0
        return U
    for i in range(H):
        for j in range(W):
            yi = (i * (s - 1) / (H - 1)) if H > 1 else 0.0
            xi = (j * (s - 1) / (W - 1)) if W > 1 else 0.0
            y0 = min(int(np.floor(yi)), s - 2)
            x0 = min(int(np.floor(xi)), s - 2)
            wy = yi - y0
            wx = xi - x0
            r = i * W + j
            U[r, y0 * s + x0] += (1 - wy) * (1 - wx)
            U[r, y0 * s + x0 + 1] += (1 - wy) * wx
            U[r, (y0 + 1) * s + x0] += wy * (1 - wx)
            U[r, (y0 + 1) * s + x0 + 1] += wy * wx
    return U


# --------------------------------- the kernels ---------------------------------

def sppm_pool_kernel(x_ref, p_ref, out_ref):
    """pooled[b] += x_tile @ [p2 | p4 | mean]; f32 accumulator resident in the out block."""
    @pl.when(pl.program_id(1) == 0)
    def _init():
        out_ref[...] = jnp.zeros_like(out_ref)
    out_ref[0] += jnp.dot(x_ref[0], p_ref[...], preferred_element_type=jnp.float32)


def sppm_pixel_kernel(x_ref, u_ref, w0s_ref, a_ref, s_ref, out_ref):
    """Per (batch, HW tile): conv0, fused upsample+conv_out matmul, residual."""
    f32 = jnp.float32
    x = x_ref[0]                                                                 # (C, T) bf16
    # conv0 on arm: the attention scale s is pre-folded into w0s, so raw x is the operand.
    o0 = jnp.maximum(jnp.dot(w0s_ref[0], x, preferred_element_type=f32), 0.0)   # (C4, T) f32
    # Single fused conv_out matmul: rhs = [U_tile (32 rows, zero-padded) ; o0 (C4 rows)].
    rhs = jnp.concatenate([u_ref[...], o0.astype(x.dtype)], axis=0)             # aligned sublane concat
    z = jnp.dot(a_ref[0], rhs, preferred_element_type=f32)                      # (C, T) f32
    arm = x.astype(f32) * s_ref[0]                                               # residual branch (f32 VPU)
    out_ref[0] = (jnp.maximum(z, 0.0) + arm).astype(out_ref.dtype)


# --------------------------------- the wrapper ---------------------------------

def _pick_hw_tile(HW, C, budget_bytes):
    """Largest multiple-of-128 divisor of HW whose per-tile working set fits the budget."""
    per_col = 18 * C + 256          # rough bytes per HW column: bf16 x/out (double-buffered),
                                    # f32 arm/z/o0, bf16 rhs, pool/upsample tile rows
    max_tile = max(128, int(budget_bytes) // per_col)
    if HW <= max_tile:
        return HW
    best = 0
    for t in range(128, max_tile + 1, 128):
        if HW % t == 0:
            best = t
    if best:
        return best
    # TODO(synk): HW with no 128-multiple divisor under the budget falls back to one
    # untiled slab; extreme shapes would need masked tail tiles instead.
    return HW


@jax.jit
def sppm_forward(x_nchw, params):
    (pfull, ufull, watt, w0, w1, w2, w4, wo0, wo4, wo2, wo1) = params
    B, C, H, W = x_nchw.shape
    HW = H * W
    C4 = C // 4
    K2 = NU_PAD + C4
    f32 = jnp.float32
    bf16 = jnp.bfloat16

    x = x_nchw.reshape(B, C, HW).astype(bf16)

    # ---- hardware-derived tiling / VMEM budget (no hard 64 MiB clamp) ----
    try:
        vmem_cap = int(pltpu.get_tpu_info().vmem_capacity_bytes)
    except Exception:
        vmem_cap = 64 * 1024 * 1024
    tile = _pick_hw_tile(HW, C, budget_bytes=int(0.40 * vmem_cap))
    nt = HW // tile
    weight_bytes = sum(int(np.prod(p.shape)) * p.dtype.itemsize
                       for p in (watt, w0, w1, w2, w4, wo0, wo4, wo2, wo1))
    need = (18 * C + 256) * tile + 2 * weight_bytes + (4 << 20)
    vmem_limit = int(min(vmem_cap, max(32 * 1024 * 1024, need)))

    # ---- pass 1: fused pooled statistics of x (2x2, 4x4, global mean) ----
    pooled = pl.pallas_call(
        sppm_pool_kernel,
        out_shape=jax.ShapeDtypeStruct((B, C, NP), f32),
        grid_spec=pltpu.PrefetchScalarGridSpec(
            num_scalar_prefetch=0,
            grid=(B, nt),
            in_specs=[pl.BlockSpec((1, C, tile), lambda b, t: (b, 0, t)),
                      pl.BlockSpec((tile, NP), lambda b, t: (t, 0))],
            out_specs=pl.BlockSpec((1, C, NP), lambda b, t: (b, 0, 0)),
        ),
        compiler_params=pltpu.CompilerParams(
            dimension_semantics=("parallel", "arbitrary"),
            vmem_limit_bytes=vmem_limit),
        cost_estimate=pl.CostEstimate(
            flops=int(2 * B * C * HW * NP), transcendentals=0,
            bytes_accessed=int(2 * B * C * HW + 2 * B * HW * NP + 4 * B * C * NP)),
    )(x, pfull)

    # ---- tiny per-batch glue (O(B*C*C) math, plain XLA, f32) ----
    gap = pooled[:, :, NP - 1:NP]                                      # mean(x) per channel
    atten = jax.nn.sigmoid(jnp.einsum('oc,bcs->bos', watt.astype(f32), gap))
    s = 1.0 + atten                                                    # (B, C, 1): arm = x * s
    pooled_s = pooled * s                                              # pooled stats of arm
    y2 = jnp.maximum(jnp.einsum('oc,bcp->bop', w2.astype(f32), pooled_s[:, :, 0:4]), 0.0)
    y4 = jnp.maximum(jnp.einsum('oc,bcp->bop', w4.astype(f32), pooled_s[:, :, 4:20]), 0.0)
    y1 = jnp.maximum(jnp.einsum('oc,bcp->bop', w1.astype(f32), pooled_s[:, :, 20:21]), 0.0)
    # Fused conv_out operator: columns match the rows of rhs = [U_pad ; o0].
    a1 = jnp.concatenate([
        jnp.einsum('oc,bcp->bop', wo4.astype(f32), y4),                # (B, C, 16)
        jnp.einsum('oc,bcp->bop', wo2.astype(f32), y2),                # (B, C, 4)
        jnp.einsum('oc,bcp->bop', wo1.astype(f32), y1),                # (B, C, 1)
        jnp.zeros((B, C, NU_PAD - NU), f32),                           # alignment pad
    ], axis=-1)
    a_full = jnp.concatenate(
        [a1, jnp.broadcast_to(wo0.astype(f32)[None], (B, C, C4))], axis=-1
    ).astype(bf16)                                                     # (B, C, K2)
    w0s = (w0.astype(f32)[None] * jnp.swapaxes(s, 1, 2)).astype(bf16)  # conv0 with s folded in

    # ---- pass 2: per-pixel phase, both grid axes parallel (v7x megacore) ----
    out = pl.pallas_call(
        sppm_pixel_kernel,
        out_shape=jax.ShapeDtypeStruct((B, C, HW), bf16),
        grid_spec=pltpu.PrefetchScalarGridSpec(
            num_scalar_prefetch=0,
            grid=(B, nt),
            in_specs=[pl.BlockSpec((1, C, tile), lambda b, t: (b, 0, t)),
                      pl.BlockSpec((NU_PAD, tile), lambda b, t: (0, t)),
                      pl.BlockSpec((1, C4, C), lambda b, t: (b, 0, 0)),
                      pl.BlockSpec((1, C, K2), lambda b, t: (b, 0, 0)),
                      pl.BlockSpec((1, C, 1), lambda b, t: (b, 0, 0))],
            out_specs=pl.BlockSpec((1, C, tile), lambda b, t: (b, 0, t)),
        ),
        compiler_params=pltpu.CompilerParams(
            dimension_semantics=("parallel", "parallel"),
            vmem_limit_bytes=vmem_limit),
        cost_estimate=pl.CostEstimate(
            flops=int(2 * B * HW * (C4 * C + C * K2)), transcendentals=0,
            bytes_accessed=int(4 * B * C * HW + 2 * B * NU_PAD * HW
                               + 2 * B * (C4 * C + C * K2 + 2 * C))),
    )(x, ufull, w0s, a_full, s)

    return out.reshape(B, C, H, W)


# ------------------------------ params & reference ------------------------------

def make_params(key, C, H, W):
    """Deterministic parameters + fused constant operator matrices (bf16)."""
    assert C % 4 == 0
    C4 = C // 4
    HW = H * W
    bf16 = jnp.bfloat16
    bn_scale = 1.0 / np.sqrt(1.0 + 1e-5)     # folded inference-mode BN (default stats/affine)
    std = 1.0 / np.sqrt(C)                   # kaiming_normal_(a=1), fan_in = C for 1x1 convs

    ks = jax.random.split(key, 6)
    watt = (jax.random.normal(ks[0], (C, C), jnp.float32) * std).astype(bf16)
    w0 = (jax.random.normal(ks[1], (C4, C), jnp.float32) * std * bn_scale).astype(bf16)
    w1 = (jax.random.normal(ks[2], (C4, C), jnp.float32) * std * bn_scale).astype(bf16)
    w2 = (jax.random.normal(ks[3], (C4, C), jnp.float32) * std * bn_scale).astype(bf16)
    w4 = (jax.random.normal(ks[4], (C4, C), jnp.float32) * std * bn_scale).astype(bf16)
    wout = jax.random.normal(ks[5], (C, C), jnp.float32) * std * bn_scale
    # torch concat order along channels: (origin, avg4, avg2, avg1)
    wo0 = wout[:, 0:C4].astype(bf16)
    wo4 = wout[:, C4:2 * C4].astype(bf16)
    wo2 = wout[:, 2 * C4:3 * C4].astype(bf16)
    wo1 = wout[:, 3 * C4:].astype(bf16)

    p2 = adaptive_pool_matrix(H, W, 2)                       # (4, HW)
    p4 = adaptive_pool_matrix(H, W, 4)                       # (16, HW)
    mean_row = np.full((1, HW), 1.0 / HW, np.float32)
    pfull = jnp.asarray(np.concatenate([p2, p4, mean_row], 0).T).astype(bf16)   # (HW, NP)

    u4 = bilinear_up_matrix(4, H, W).T                       # (16, HW)
    u2 = bilinear_up_matrix(2, H, W).T                       # (4, HW)
    ones_row = np.ones((1, HW), np.float32)
    pad = np.zeros((NU_PAD - NU, HW), np.float32)
    ufull = jnp.asarray(np.concatenate([u4, u2, ones_row, pad], 0)).astype(bf16)  # (NU_PAD, HW)

    return (pfull, ufull, watt, w0, w1, w2, w4, wo0, wo4, wo2, wo1)


def sppm_reference(x_nchw, params):
    """Plain-JAX (f32) reference using the same bf16 params / operator matrices."""
    (pfull, ufull, watt, w0, w1, w2, w4, wo0, wo4, wo2, wo1) = params
    f32 = jnp.float32
    B, C, H, W = x_nchw.shape
    HW = H * W
    x = x_nchw.reshape(B, C, HW).astype(jnp.bfloat16).astype(f32)   # same input rounding as kernel
    P = pfull.astype(f32)
    U = ufull.astype(f32)

    gap = jnp.einsum('bcs,s->bc', x, P[:, NP - 1])[..., None]        # (B, C, 1)
    atten = jax.nn.sigmoid(jnp.einsum('oc,bcs->bos', watt.astype(f32), gap))
    arm = x * (1.0 + atten)

    def cbr(w, t):
        return jnp.maximum(jnp.einsum('oc,bcs->bos', w.astype(f32), t), 0.0)

    o0 = cbr(w0, arm)
    y1 = cbr(w1, jnp.einsum('bcs,s->bc', arm, P[:, NP - 1])[..., None])
    y2 = cbr(w2, jnp.einsum('bcs,sp->bcp', arm, P[:, 0:4]))
    y4 = cbr(w4, jnp.einsum('bcs,sp->bcp', arm, P[:, 4:20]))

    up4 = jnp.einsum('bcp,ps->bcs', y4, U[0:16])
    up2 = jnp.einsum('bcp,ps->bcs', y2, U[16:20])
    up1 = jnp.broadcast_to(y1, (B, y1.shape[1], HW))

    z = (jnp.einsum('oc,bcs->bos', wo0.astype(f32), o0)
         + jnp.einsum('oc,bcs->bos', wo4.astype(f32), up4)
         + jnp.einsum('oc,bcs->bos', wo2.astype(f32), up2)
         + jnp.einsum('oc,bcs->bos', wo1.astype(f32), up1))
    o = jnp.maximum(z, 0.0) + arm
    return o.reshape(B, C, H, W)


if __name__ == "__main__":
    B, C, H, W = 2, 8, 16, 16     # in_cls must be divisible by 4
    key = jax.random.PRNGKey(0)
    kx, kp = jax.random.split(key)
    x = jax.random.normal(kx, (B, C, H, W), jnp.float32)
    params = make_params(kp, C, H, W)

    out = jax.block_until_ready(sppm_forward(x, params))
    ref = jax.block_until_ready(sppm_reference(x, params))
    # bf16 I/O + bf16 MXU operands -> looser tolerance than a pure-f32 pipeline.
    np.testing.assert_allclose(np.asarray(out.astype(jnp.float32)),
                               np.asarray(ref.astype(jnp.float32)),
                               rtol=5e-2, atol=5e-2)
    print("KERNEL_OK")
</pallas_src>

<mosaic_0001>
module attributes {stable_mosaic.version = 11 : i64} {
  func.func @sppm_pool_kernel(%arg0: i32, %arg1: i32, %arg2: memref<1x8x256xbf16, #tpu.memory_space<vmem>>, %arg3: memref<256x21xbf16, #tpu.memory_space<vmem>>, %arg4: memref<1x8x21xf32, #tpu.memory_space<vmem>>) attributes {dimension_semantics = [#tpu.dimension_semantics<parallel>, #tpu.dimension_semantics<arbitrary>], iteration_bounds = array<i64: 2, 1>, scalar_prefetch = 0 : i64, scratch_operands = 0 : i64, tpu.core_type = #tpu.core_type<tc>, window_params = [{transform_indices = @transform_0, window_bounds = array<i64: 1, 8, 256>}, {transform_indices = @transform_1, window_bounds = array<i64: 256, 21>}, {transform_indices = @transform_2, window_bounds = array<i64: 1, 8, 21>}]} {
    %c0_i32 = arith.constant 0 : i32
    %0 = arith.cmpi eq, %arg1, %c0_i32 : i32
    %1 = arith.extui %0 : i1 to i32
    %c0_i32_0 = arith.constant 0 : i32
    %2 = arith.cmpi ne, %1, %c0_i32_0 : i32
    scf.if %2 {
      %cst_11 = arith.constant 0.000000e+00 : f32
      %13 = vector.broadcast %cst_11 : f32 to vector<1x8x21xf32>
      %c0_12 = arith.constant 0 : index
      %c0_13 = arith.constant 0 : index
      %c0_14 = arith.constant 0 : index
      %14 = vector.load %arg4[%c0_12, %c0_13, %c0_14] : memref<1x8x21xf32, #tpu.memory_space<vmem>>, vector<1x8x21xf32>
      tpu.vector_store %arg4[%c0_12, %c0_13, %c0_14], %13 {strides = array<i32>} : memref<1x8x21xf32, #tpu.memory_space<vmem>>, vector<1x8x21xf32>,
    } else {
    }
    %c0 = arith.constant 0 : index
    %c0_1 = arith.constant 0 : index
    %c0_2 = arith.constant 0 : index
    %3 = vector.load %arg4[%c0, %c0_1, %c0_2] : memref<1x8x21xf32, #tpu.memory_space<vmem>>, vector<1x8x21xf32>
    %4 = vector.shape_cast %3 : vector<1x8x21xf32> to vector<8x21xf32>
    %c0_3 = arith.constant 0 : index
    %c0_4 = arith.constant 0 : index
    %c0_5 = arith.constant 0 : index
    %5 = vector.load %arg2[%c0_3, %c0_4, %c0_5] : memref<1x8x256xbf16, #tpu.memory_space<vmem>>, vector<1x8x256xbf16>
    %6 = vector.shape_cast %5 : vector<1x8x256xbf16> to vector<8x256xbf16>
    %c0_6 = arith.constant 0 : index
    %c0_7 = arith.constant 0 : index
    %7 = vector.load %arg3[%c0_6, %c0_7] : memref<256x21xbf16, #tpu.memory_space<vmem>>, vector<256x21xbf16>
    %cst = arith.constant dense<0.000000e+00> : vector<8x21xf32>
    %8 = tpu.matmul %6, %7, %cst {dimension_numbers = #tpu.dot_dimension_numbers<[1], [0], [0], [1], [0, 0, 1, 1], [], []>} : vector<8x256xbf16>, vector<256x21xbf16>, vector<8x21xf32> -> vector<8x21xf32>
    %9 = arith.addf %4, %8 : vector<8x21xf32>
    %c0_8 = arith.constant 0 : index
    %c0_9 = arith.constant 0 : index
    %c0_10 = arith.constant 0 : index
    %10 = vector.load %arg4[%c0_8, %c0_9, %c0_10] : memref<1x8x21xf32, #tpu.memory_space<vmem>>, vector<1x8x21xf32>
    %11 = vector.shape_cast %10 : vector<1x8x21xf32> to vector<8x21xf32>
    %12 = vector.shape_cast %9 : vector<8x21xf32> to vector<1x8x21xf32>
    tpu.vector_store %arg4[%c0_8, %c0_9, %c0_10], %12 {strides = array<i32>} : memref<1x8x21xf32, #tpu.memory_space<vmem>>, vector<1x8x21xf32>,
    return
  }
  func.func @transform_0(%arg0: i32, %arg1: i32) -> (i32, i32, i32) {
    %c0_i32 = arith.constant 0 : i32
    %c0_i32_0 = arith.constant 0 : i32
    return %arg0, %c0_i32, %arg1 : i32, i32, i32
  }
  func.func @transform_1(%arg0: i32, %arg1: i32) -> (i32, i32) {
    %c0_i32 = arith.constant 0 : i32
    %c0_i32_0 = arith.constant 0 : i32
    return %arg1, %c0_i32 : i32, i32
  }
  func.func @transform_2(%arg0: i32, %arg1: i32) -> (i32, i32, i32) {
    %c0_i32 = arith.constant 0 : i32
    %c0_i32_0 = arith.constant 0 : i32
    %c0_i32_1 = arith.constant 0 : i32
    return %arg0, %c0_i32, %c0_i32_0 : i32, i32, i32
  }
}

module attributes {stable_mosaic.version = 11 : i64} {
  func.func @sppm_pixel_kernel(%arg0: i32, %arg1: i32, %arg2: memref<1x8x256xbf16, #tpu.memory_space<vmem>>, %arg3: memref<32x256xbf16, #tpu.memory_space<vmem>>, %arg4: memref<1x2x8xbf16, #tpu.memory_space<vmem>>, %arg5: memref<1x8x34xbf16, #tpu.memory_space<vmem>>, %arg6: memref<1x8x1xf32, #tpu.memory_space<vmem>>, %arg7: memref<1x8x256xbf16, #tpu.memory_space<vmem>>) attributes {dimension_semantics = [#tpu.dimension_semantics<parallel>, #tpu.dimension_semantics<parallel>], iteration_bounds = array<i64: 2, 1>, scalar_prefetch = 0 : i64, scratch_operands = 0 : i64, tpu.core_type = #tpu.core_type<tc>, window_params = [{transform_indices = @transform_0, window_bounds = array<i64: 1, 8, 256>}, {transform_indices = @transform_1, window_bounds = array<i64: 32, 256>}, {transform_indices = @transform_2, window_bounds = array<i64: 1, 2, 8>}, {transform_indices = @transform_3, window_bounds = array<i64: 1, 8, 34>}, {transform_indices = @transform_4, window_bounds = array<i64: 1, 8, 1>}, {transform_indices = @transform_5, window_bounds = array<i64: 1, 8, 256>}]} {
    %c0 = arith.constant 0 : index
    %c0_0 = arith.constant 0 : index
    %c0_1 = arith.constant 0 : index
    %0 = vector.load %arg2[%c0, %c0_0, %c0_1] : memref<1x8x256xbf16, #tpu.memory_space<vmem>>, vector<1x8x256xbf16>
    %1 = vector.shape_cast %0 : vector<1x8x256xbf16> to vector<8x256xbf16>
    %c0_2 = arith.constant 0 : index
    %c0_3 = arith.constant 0 : index
    %c0_4 = arith.constant 0 : index
    %2 = vector.load %arg4[%c0_2, %c0_3, %c0_4] : memref<1x2x8xbf16, #tpu.memory_space<vmem>>, vector<1x2x8xbf16>
    %3 = vector.shape_cast %2 : vector<1x2x8xbf16> to vector<2x8xbf16>
    %cst = arith.constant dense<0.000000e+00> : vector<2x256xf32>
    %4 = tpu.matmul %3, %1, %cst {dimension_numbers = #tpu.dot_dimension_numbers<[1], [0], [0], [1], [0, 0, 1, 1], [], []>} : vector<2x8xbf16>, vector<8x256xbf16>, vector<2x256xf32> -> vector<2x256xf32>
    %cst_5 = arith.constant 0.000000e+00 : f32
    %5 = vector.broadcast %cst_5 : f32 to vector<2x256xf32>
    %6 = arith.maximumf %4, %5 : vector<2x256xf32>
    %c0_6 = arith.constant 0 : index
    %c0_7 = arith.constant 0 : index
    %7 = vector.load %arg3[%c0_6, %c0_7] : memref<32x256xbf16, #tpu.memory_space<vmem>>, vector<32x256xbf16>
    %8 = arith.truncf %6 : vector<2x256xf32> to vector<2x256xbf16>
    %9 = tpu.concatenate %7, %8 in 0 : vector<32x256xbf16>, vector<2x256xbf16> -> vector<34x256xbf16>
    %c0_8 = arith.constant 0 : index
    %c0_9 = arith.constant 0 : index
    %c0_10 = arith.constant 0 : index
    %10 = vector.load %arg5[%c0_8, %c0_9, %c0_10] : memref<1x8x34xbf16, #tpu.memory_space<vmem>>, vector<1x8x34xbf16>
    %11 = vector.shape_cast %10 : vector<1x8x34xbf16> to vector<8x34xbf16>
    %cst_11 = arith.constant dense<0.000000e+00> : vector<8x256xf32>
    %12 = tpu.matmul %11, %9, %cst_11 {dimension_numbers = #tpu.dot_dimension_numbers<[1], [0], [0], [1], [0, 0, 1, 1], [], []>} : vector<8x34xbf16>, vector<34x256xbf16>, vector<8x256xf32> -> vector<8x256xf32>
    %13 = arith.extf %1 : vector<8x256xbf16> to vector<8x256xf32>
    %c0_12 = arith.constant 0 : index
    %c0_13 = arith.constant 0 : index
    %c0_14 = arith.constant 0 : index
    %14 = vector.load %arg6[%c0_12, %c0_13, %c0_14] : memref<1x8x1xf32, #tpu.memory_space<vmem>>, vector<1x8x1xf32>
    %15 = vector.shape_cast %14 : vector<1x8x1xf32> to vector<8x1xf32>
    %16 = vector.broadcast %15 : vector<8x1xf32> to vector<8x256xf32>
    %17 = arith.mulf %13, %16 : vector<8x256xf32>
    %cst_15 = arith.constant 0.000000e+00 : f32
    %18 = vector.broadcast %cst_15 : f32 to vector<8x256xf32>
    %19 = arith.maximumf %12, %18 : vector<8x256xf32>
    %20 = arith.addf %19, %17 : vector<8x256xf32>
    %21 = arith.truncf %20 : vector<8x256xf32> to vector<8x256xbf16>
    %c0_16 = arith.constant 0 : index
    %c0_17 = arith.constant 0 : index
    %c0_18 = arith.constant 0 : index
    %22 = vector.load %arg7[%c0_16, %c0_17, %c0_18] : memref<1x8x256xbf16, #tpu.memory_space<vmem>>, vector<1x8x256xbf16>
    %23 = vector.shape_cast %22 : vector<1x8x256xbf16> to vector<8x256xbf16>
    %24 = vector.shape_cast %21 : vector<8x256xbf16> to vector<1x8x256xbf16>
    tpu.vector_store %arg7[%c0_16, %c0_17, %c0_18], %24 {strides = array<i32>} : memref<1x8x256xbf16, #tpu.memory_space<vmem>>, vector<1x8x256xbf16>,
    return
  }
  func.func @transform_0(%arg0: i32, %arg1: i32) -> (i32, i32, i32) {
    %c0_i32 = arith.constant 0 : i32
    %c0_i32_0 = arith.constant 0 : i32
    return %arg0, %c0_i32, %arg1 : i32, i32, i32
  }
  func.func @transform_1(%arg0: i32, %arg1: i32) -> (i32, i32) {
    %c0_i32 = arith.constant 0 : i32
    %c0_i32_0 = arith.constant 0 : i32
    return %c0_i32, %arg1 : i32, i32
  }
  func.func @transform_2(%arg0: i32, %arg1: i32) -> (i32, i32, i32) {
    %c0_i32 = arith.constant 0 : i32
    %c0_i32_0 = arith.constant 0 : i32
    %c0_i32_1 = arith.constant 0 : i32
    return %arg0, %c0_i32, %c0_i32_0 : i32, i32, i32
  }
  func.func @transform_3(%arg0: i32, %arg1: i32) -> (i32, i32, i32) {
    %c0_i32 = arith.constant 0 : i32
    %c0_i32_0 = arith.constant 0 : i32
    %c0_i32_1 = arith.constant 0 : i32
    return %arg0, %c0_i32, %c0_i32_0 : i32, i32, i32
  }
  func.func @transform_4(%arg0: i32, %arg1: i32) -> (i32, i32, i32) {
    %c0_i32 = arith.constant 0 : i32
    %c0_i32_0 = arith.constant 0 : i32
    %c0_i32_1 = arith.constant 0 : i32
    return %arg0, %c0_i32, %c0_i32_0 : i32, i32, i32
  }
  func.func @transform_5(%arg0: i32, %arg1: i32) -> (i32, i32, i32) {
    %c0_i32 = arith.constant 0 : i32
    %c0_i32_0 = arith.constant 0 : i32
    return %arg0, %c0_i32, %arg1 : i32, i32, i32
  }
}

</mosaic_0001>

<bundles_post_ra>
// kernel: sppm_forward.2
= control target key start
LH: loop header
LB: loop body
LE: loop exit
PB: predicated region body
PF: predicated region fallthrough
CT: control target
= control target key end

     0   :  { %s597_s9 = smov 0   ;;  %s599_s10 = smov 0   ;;  %s685_s0 = inlined_call_operand.vmem [shape: bf16[2,8,256], index: 0, kind: input, shape index: {}]   ;;  %s686_s1 = inlined_call_operand.vmem [shape: bf16[256,21], index: 1, kind: input, shape index: {}]   ;;  %s687_s2 = inlined_call_operand.vmem [shape: f32[2,8,21], index: 2, kind: output, shape index: {}]  }
   0x1   :  { %s601_s11 = smov 0  }
   0x2 LB: > { %s24_s12 = sadd.s32 1, %s575_s10  ;;  %p467_p0 = scmp.ge.s32.totalorder %s579_s11, 1  ;;  %s579_s11 = sphi %s601_s11, %s12_s11   ;;  %s575_s10 = sphi %s599_s10, %s689_s10   ;;  %s571_s9 = sphi %s597_s9, %s688_s9  }
   0x3   : > { %p26_p1 = scmp.ge.s32.totalorder %s24_s12, 2  ;;  %p142_p2 = scmp.lt.s32.totalorder %s579_s11, 3 }
   0x5   : > { %s691_s12 = smov (%p26_p1, %s24_s12), 0  ;;  %p143_p3 = pnand %p467_p0, %p142_p2 }
   0x6   : > { %v539_v0 = vld [vmem:[%s686_s1 + $0x40] sm:$0xff] (!%p143_p3)   ;;  %p173_p4 = scmp.lt.s32.totalorder (!%p143_p3), %s571_s9, 1  ;;  %vm197_vm0 = vcmask (!%p143_p3), 171008   ;;  %v541_v2 = vld [vmem:[%s686_s1 + $0x48] sm:$0xff] (!%p143_p3)   ;;  %v543_v4 = vld [vmem:[%s686_s1 + $0x50] sm:$0xff] (!%p143_p3)   ;;  %v581_v5 = vmov (!%p143_p3), 0.0  }
   0x7   : > { %146 = sbr.rel (%p143_p3) target bundleno = 257 (0x101), region = 28  ;;  %v540_v1 = vld [vmem:[%s686_s1] sm:$0xff] (!%p143_p3)   ;;  %492 = vmatprep.subr.bf16.mxu0 (!%p143_p3), %v539_v0  ;;  %v542_v3 = vld [vmem:[%s686_s1 + $0x8] sm:$0xff] (!%p143_p3)   ;;  %v544_v6 = vld [vmem:[%s686_s1 + $0x10] sm:$0xff] (!%p143_p3)  }
   0x8   : > { %493 = vmatpush3.bf16.msra.mxu0 (!%p143_p3), %v540_v1  ;;  %v545_v7 = vld [vmem:[%s686_s1 + $0x58] sm:$0xff] (!%p143_p3)   ;;  %v547_v9 = vld [vmem:[%s686_s1 + $0x60] sm:$0xff] (!%p143_p3)   ;;  %v549_v11 = vld [vmem:[%s686_s1 + $0x68] sm:$0xff] (!%p143_p3)  }
   0x9   : > { %494 = vmatprep.subr.bf16.mxu0 (!%p143_p3), %v541_v2  ;;  %v546_v8 = vld [vmem:[%s686_s1 + $0x18] sm:$0xff] (!%p143_p3)   ;;  %v548_v10 = vld [vmem:[%s686_s1 + $0x20] sm:$0xff] (!%p143_p3)   ;;  %v550_v14 = vld [vmem:[%s686_s1 + $0x28] sm:$0xff] (!%p143_p3)  }
   0xa   : > { %v551_v15 = vld [vmem:[%s686_s1 + $0x70] sm:$0xff] (!%p143_p3)   ;;  %v553_v17 = vld [vmem:[%s686_s1 + $0x78] sm:$0xff] (!%p143_p3)  }
   0xb   : > { %v552_v16 = vld [vmem:[%s686_s1 + $0x30] sm:$0xff] (!%p143_p3)   ;;  %v554_v18 = vld [vmem:[%s686_s1 + $0x38] sm:$0xff] (!%p143_p3)  }
   0xc   : > { %495 = vmatpush3.bf16.msra.mxu0 (!%p143_p3), %v542_v3 }
   0xd   : > { %496 = vmatprep.subr.bf16.mxu0 (!%p143_p3), %v543_v4 }
   0xe   : > { %s693_s9 = smov (!%p173_p4, %s571_s9), 1 }
   0xf   : > { %s491_s23 = sshll.u32 %s693_s9, 3 }
  0x10   : > { %s633_s26 = scalar_lea.vmem %s687_s2, %s491_s23  ;;  %497 = vmatpush3.bf16.msra.mxu0 %v544_v6  ;;  %s180_s9 = scalar_lea.vmem %s685_s0, %s491_s23 }
  0x11   : > { %198 = vst.msk [vmem:[%s633_s26] sm:$0xff] %vm197_vm0, %v581_v5  ;;  %498 = vmatprep.subr.bf16.mxu0 %v545_v7  ;;  %v200_v12 = vld [vmem:[%s180_s9] sm:$0xff] }
  0x12   : > { %v472_v13 = vcombine.high %v200_v12, %v200_v12  ;;  %v471_v19 = vcombine.low %v200_v12, %v200_v12 }
  0x14   : > { %499 = vmatpush3.bf16.msra.mxu0 %v546_v8  ;;  %368 = vmatprep.mubr.bf16.mxu0 %v472_v13 }
  0x15   : > { %500 = vmatprep.subr.bf16.mxu0 %v547_v9 }
  0x18   : > { %501 = vmatpush3.bf16.msra.mxu0 %v548_v10  ;;  %v199_v21 = vld [vmem:[%s633_s26] sm:$0xff] }
  0x19   : > { %502 = vmatprep.subr.bf16.mxu0 %v549_v11 }
  0x1c   : > { %503 = vmatpush3.bf16.msra.mxu0 %v550_v14 }
  0x1d   : > { %504 = vmatprep.subr.bf16.mxu0 %v551_v15 }
  0x20   : > { %505 = vmatpush3.bf16.msra.mxu0 %v552_v16 }
  0x21   : > { %506 = vmatprep.subr.bf16.mxu0 %v553_v17 }
  0x24   : > { %507 = vmatpush3.bf16.msra.mxu0 %v554_v18 }
  0x27   : > { %369 = vmatmul.mubr.bf16.vlgmr.msra.gmra.mrb[0].mxu0 %v471_v19 }
  0xfa   : > { %v508_v20 = vpop.f32.mrb[0].mxu0 }
  0xfb   : > { %v509_v22 = vpop.f32.mrb[1].mxu0 }
  0xfc   : > { %v510_v23 = vadd.f32 %v509_v22, %v508_v20  ;;  %v511_v24 = vpop.f32.mrb[2].mxu0 }
  0xfd   : > { %v512_v25 = vpop.f32.mrb[3].mxu0 }
  0xfe   : > { %v376_v26 = vadd.f32 %v510_v23, %v199_v21 }
 0x100   : > { %378 = vst.msk [vmem:[%s633_s26] sm:$0xff] %vm197_vm0, %v376_v26 }
 0x101 PF: > { %s12_s11 = sadd.s32 1, %s579_s11   ;;  %s688_s9 = smov %s575_s10 }
 0x102   : > { %p9_p5 = scmp.ge.s32.totalorder %s12_s11, 4   ;;  %s689_s10 = smov %s691_s12 }
 0x104   :  { %11 = sbr.rel (!%p9_p5) target bundleno = 2 (0x2), region = 65 }

// kernel: sppm_forward.3
= control target key start
LH: loop header
LB: loop body
LE: loop exit
PB: predicated region body
PF: predicated region fallthrough
CT: control target
= control target key end

     0   :  { %s750_s18 = smov 0   ;;  %s752_s19 = smov 0   ;;  %s814_s0 = inlined_call_operand.vmem [shape: bf16[2,8,256], index: 0, kind: input, shape index: {}]   ;;  %s815_s1 = inlined_call_operand.vmem [shape: bf16[32,256], index: 1, kind: input, shape index: {}]   ;;  %s816_s2 = inlined_call_operand.vmem [shape: bf16[2,2,8], index: 2, kind: input, shape index: {}]   ;;  %s817_s3 = inlined_call_operand.vmem [shape: bf16[2,8,34], index: 3, kind: input, shape index: {}]   ;;  %s818_s4 = inlined_call_operand.vmem [shape: f32[2,8,1], index: 4, kind: input, shape index: {}]   ;;  %s819_s5 = inlined_call_operand.vmem [shape: bf16[2,8,256], index: 5, kind: output, shape index: {}]  }
   0x1   :  { %s754_s20 = smov 0  }
   0x2 LB: > { %s27_s21 = sadd.s32 1, %s713_s19  ;;  %p638_p0 = scmp.ge.s32.totalorder %s717_s20, 1  ;;  %s717_s20 = sphi %s754_s20, %s15_s20   ;;  %s713_s19 = sphi %s752_s19, %s821_s19   ;;  %s709_s18 = sphi %s750_s18, %s820_s18  }
   0x3   : > { %p29_p1 = scmp.ge.s32.totalorder %s27_s21, 2  ;;  %p245_p2 = scmp.lt.s32.totalorder %s717_s20, 3 }
   0x5   : > { %s823_s21 = smov (%p29_p1, %s27_s21), 0  ;;  %p246_p3 = pnand %p638_p0, %p245_p2 }
   0x6   : > { %p298_p4 = scmp.lt.s32.totalorder (!%p246_p3), %s709_s18, 1  ;;  %v719_v0 = vmov (!%p246_p3), 0   ;;  %v689_v1 = vld [vmem:[%s815_s1 + $0x4] ss:$8 sps:$4 sm:$0xff] (!%p246_p3)   ;;  %v691_v2 = vld [vmem:[%s815_s1] ss:$8 sps:$4 sm:$0xff] (!%p246_p3)  }
   0x7   : > { %249 = sbr.rel (%p246_p3) target bundleno = 465 (0x1d1), region = 40  ;;  %385 = vmatprep.mubr.bf16.mxu0 (!%p246_p3), %v719_v0  ;;  %466 = vmatprep.mubr.bf16.mxu1 (!%p246_p3), %v719_v0  ;;  %vm346_vm0 = vcmask (!%p246_p3), 1043456   ;;  %vm342_vm1 = vcmask (!%p246_p3), 64512   ;;  %v692_v8 = vld [vmem:[%s815_s1 + $0x14] ss:$8 sps:$4 sm:$0xff] (!%p246_p3)   ;;  %vm427_vm2 = vcmask (!%p246_p3), 1040384  }
   0x8   : > { %686 = vset.pattern.permute.xlu0 (!%p246_p3), %v719_v0  ;;  %434 = vmatprep.subr.bf16.mxu1 (!%p246_p3), %v689_v1  ;;  %v694_v9 = vld [vmem:[%s815_s1 + $0x10] ss:$8 sps:$4 sm:$0xff] (!%p246_p3)   ;;  %vm423_vm3 = vcmask (!%p246_p3), 277504  }
   0x9   : > { %435 = vmatpush1.bf16.msra.mxu1 (!%p246_p3), %v691_v2 }
   0xa   : > { %436 = vmatprep.subr.bf16.mxu1 (!%p246_p3), %v692_v8 }
   0xd   : > { %437 = vmatpush1.bf16.msra.mxu1 (!%p246_p3), %v694_v9 }
   0xe   : > { %s825_s18 = smov (!%p298_p4, %s709_s18), 1 }
   0xf   : > { %s777_s26 = sshll.u32 %s825_s18, 3  ;;  %s315_s7 = scalar_lea.vmem %s816_s2, %s825_s18 }
  0x10   : > { %s305_s29 = scalar_lea.vmem %s814_s0, %s777_s26  ;;  %v336_v7 = vld [vmem:[%s315_s7] sm:$0x1]  ;;  %s323_s14 = scalar_lea.vmem %s818_s4, %s777_s26 }
  0x11   : > { %v335_v3 = vld [vmem:[%s305_s29] sm:$0xff]  ;;  %s641_s15 = sshll.u32 %s825_s18, 2  ;;  %s332_s24 = scalar_lea.vmem %s819_s5, %s777_s26 }
  0x12   : > { %v646_v4 = vcombine.high %v335_v3, %v335_v3  ;;  %v645_v5 = vcombine.low %v335_v3, %v335_v3  ;;  %v477_v10 = vld [vmem:[%s323_s14] sm:$0xff]  ;;  %s319_s22 = scalar_lea.vmem %s817_s3, %s641_s15  ;;  %v475_v21 = vunpack.c.l.bf16 %v335_v3  ;;  %v476_v23 = vunpack.c.h.bf16 %v335_v3 }
  0x13   : > { %480 = vperm.xlu0 %686, %v477_v10   ;;  %v422_v20 = vld [vmem:[%s319_s22] sm:$0xf] }
  0x14   : > { %647 = vmatprep.subr.msk.bf16.mxu0 %vm346_vm0, %v646_v4  ;;  %v348_v6 = vsel %vm346_vm0, %v645_v5, 0 }
  0x15   : > { %354 = vmatpush1.bf16.msra.mxu0 %v348_v6 }
  0x18   : > { %648 = vmatmul.mubr.msk.bf16.vlgmr.msra.gmra.mrb[0].mxu0 %vm342_vm1, %v336_v7 }
  0x92   : > { %v481_v22 = vpop.permute.xlu0 %480 }
  0x93   : > { %v483_v24 = vmul.f32 %v481_v22, %v475_v21  ;;  %v484_v25 = vmul.f32 %v481_v22, %v476_v23 }
  0xeb   : > { %v387_v11 = vpop.f32.mrb[0].mxu0 }
  0xec   : > { %v394_v12 = vmax.f32 %v387_v11, 0.0  ;;  %v389_v13 = vpop.f32.mrb[1].mxu0 }
  0xed   : > { %v395_v14 = vmax.f32 %v389_v13, 0.0  ;;  %v391_v15 = vpop.f32.mrb[2].mxu0 }
  0xee   : > { %v400_v16 = vpack.c.bf16 %v394_v12, %v394_v12  ;;  %v392_v17 = vpop.f32.mrb[3].mxu0 }
  0xef   : > { %v401_v18 = vpack.c.bf16 %v395_v14, %v395_v14 }
  0xf0   : > { %v429_v19 = vsel %vm427_vm2, %v400_v16, 0 }
  0xf1   : > { %653 = vmatprep.subr.msk.bf16.mxu1 %vm427_vm2, %v401_v18 }
  0xf2   : > { %439 = vmatpush1.bf16.msra.mxu1 %v429_v19 }
  0xf5   : > { %654 = vmatmul.mubr.msk.bf16.vlgmr.msra.gmra.mrb[0].mxu1 %vm423_vm3, %v422_v20 }
 0x1c8   : > { %v468_v26 = vpop.f32.mrb[0].mxu1 }
 0x1c9   : > { %v485_v27 = vmax.f32 %v468_v26, 0.0  ;;  %v470_v28 = vpop.f32.mrb[1].mxu1 }
 0x1ca   : > { %v486_v29 = vmax.f32 %v470_v28, 0.0  ;;  %v472_v30 = vpop.f32.mrb[2].mxu1 }
 0x1cb   : > { %v487_v31 = vadd.f32 %v485_v27, %v483_v24  ;;  %v473_v32 = vpop.f32.mrb[3].mxu1 }
 0x1cc   : > { %v488_v33 = vadd.f32 %v486_v29, %v484_v25 }
 0x1ce   : > { %v660_v34 = vpack.c.bf16 %v488_v33, %v487_v31 }
 0x1d0   : > { %497 = vst [vmem:[%s332_s24] sm:$0xff] %v660_v34 }
 0x1d1 PF: > { %s15_s20 = sadd.s32 1, %s717_s20   ;;  %s820_s18 = smov %s713_s19 }
 0x1d2   : > { %p12_p5 = scmp.ge.s32.totalorder %s15_s20, 4   ;;  %s821_s19 = smov %s823_s21 }
 0x1d4   :  { %14 = sbr.rel (!%p12_p5) target bundleno = 2 (0x2), region = 82 }

</bundles_post_ra>
